<compile_context>
chip_gen: v7x
topology: tpu7x:2x2x1
jax: 0.10.0
libtpu: 0.0.40
codegen_flags: <defaults>
</compile_context>

<pallas_src>
import math
from functools import partial

import jax
import jax.numpy as jnp
from jax import lax
from jax.experimental import pallas as pl
from jax.experimental.pallas import tpu as pltpu

_LANE = 128
_SUB = 8


def _round_up(a, b):
    return ((a + b - 1) // b) * b


def _monotonic_kernel(w_ref, b_ref, x_ref, out_ref, *, group_offsets, chunk_rows):
    """One batch tile.

    w_ref  : SMEM (H*F,) f32  effective monotone weights, row-major (index j*F + i)
    b_ref  : SMEM (H,)   f32  bias
    x_ref  : VMEM (F, tile_rows, 128) batch tile, feature-major, batch lane-dense
    out_ref: VMEM (tile_rows, 128) f32
    """
    n_feat = x_ref.shape[0]
    tile_rows = x_ref.shape[1]
    n_hidden = b_ref.shape[0]
    n_chunks = tile_rows // chunk_rows

    # Hoist every SMEM scalar read out of the chunk loop (JAX does not CSE these and
    # Mosaic will not reliably hoist SMEM loads across the fori_loop).
    w = [[w_ref[j * n_feat + i] for i in range(n_feat)] for j in range(n_hidden)]
    b = [b_ref[j] for j in range(n_hidden)]

    def chunk_body(r, carry):
        base = pl.multiple_of(r * chunk_rows, chunk_rows)
        # (F, chunk_rows, 128) chunk; cast to f32 per chunk, not per full tile plane.
        chunk = x_ref[:, pl.ds(base, chunk_rows), :].astype(jnp.float32)
        feats = [chunk[i] for i in range(n_feat)]           # (chunk_rows, 128) each

        result = None
        for g in range(len(group_offsets) - 1):
            gmax = None
            for j in range(group_offsets[g], group_offsets[g + 1]):
                # h_j = sum_i w_eff[j, i] * x[:, i] + b[j]; bias fused into first MAC.
                acc = feats[0] * w[j][0] + b[j]
                for i in range(1, n_feat):
                    acc = acc + feats[i] * w[j][i]
                gmax = acc if gmax is None else jnp.maximum(gmax, acc)      # MaxLayer
            result = gmax if result is None else jnp.minimum(result, gmax)  # MinLayer

        out_ref[pl.ds(base, chunk_rows), :] = result.astype(out_ref.dtype)
        return carry

    lax.fori_loop(0, n_chunks, chunk_body, 0)


def _vmem_limit_bytes():
    cap = 64 << 20  # conservative fallback = v7x per-core VMEM
    try:
        info = pltpu.get_tpu_info()
        cap = int(getattr(info, "vmem_capacity_bytes", cap)) or cap
    except Exception:
        pass
    return int(min(cap // 2, 64 << 20))


def monotonic_net_forward(x, weight, bias, signs, group_sizes, *,
                          feature_major=False, max_tile_b=None, chunk_rows=32):
    """MonotonicNet forward.

    x           : (B, F) batch-major, or (F, B) if feature_major=True (fast path, no
                  relayout at all).  Any float dtype on the wire (bf16 recommended on v5e).
    weight      : (H, F) latent weights;  bias: (H,);  signs: (F,) of +/-1 (increasing).
    group_sizes : list of group sizes, sum == H.
    Returns (B, 1) float32.
    """
    if feature_major:
        F, B = x.shape
    else:
        B, F = x.shape
    H = weight.shape[0]
    assert len(group_sizes) >= 1 and all(s >= 1 for s in group_sizes)
    assert sum(group_sizes) == H
    assert weight.shape == (H, F) and bias.shape == (H,) and signs.shape == (F,)
    # NOTE: the kernel uses scalar-broadcast VPU MACs (H*F per batch element), which is
    # the right call for small H, F.  For H, F beyond ~32-64, switch the inner product to
    # an MXU jnp.dot over batch slabs instead of this path.

    offsets = [0]
    for s in group_sizes:
        offsets.append(offsets[-1] + s)
    offsets = tuple(offsets)

    # Monotone weight transform folded once per call; flattened 1D for cheap SMEM layout.
    w_eff = (jnp.exp(weight.astype(jnp.float32))
             * signs.astype(jnp.float32)[None, :]).reshape(-1)     # (H*F,)
    bias1 = bias.astype(jnp.float32).reshape(-1)                   # (H,)

    # ---- generation-aware tile size: double-buffered in+out sized to 75% of the limit.
    itemsize = x.dtype.itemsize
    packing = max(1, 4 // itemsize)                # sublane packing for sub-32-bit dtypes
    unit = _LANE * _SUB * packing                  # minimal aligned batch tile (rows)
    vmem_limit = _vmem_limit_bytes()
    budget = (vmem_limit * 3) // 4
    per_row = 2 * (F * itemsize + 4)               # 2x input block + 2x f32 output block
    tile_b = max(unit, (budget // per_row) // unit * unit)
    if max_tile_b is not None:
        tile_b = max(unit, min(tile_b, (max_tile_b // unit) * unit))
    b_unit = _round_up(max(B, 1), unit)
    tile_b = min(tile_b, b_unit)
    if b_unit >= 2 * unit and tile_b >= b_unit:
        # Keep >= 2 batch tiles so the "parallel" grid axis can feed both v7x TensorCores.
        tile_b = _round_up(b_unit // 2, unit)
    b_pad = _round_up(max(B, 1), tile_b)
    rows, tile_rows = b_pad // _LANE, tile_b // _LANE

    # Compute-chunk size must divide the tile (tile_rows is a multiple of 8*packing).
    cr = max(1, min(chunk_rows, tile_rows))
    while tile_rows % cr:
        cr //= 2

    # ---- layout plumbing (batch index b lives at (row, lane) = (b // 128, b % 128)).
    if feature_major:
        xt = x if b_pad == B else jnp.pad(x, ((0, 0), (0, b_pad - B)))
    else:
        # Batch-major input: batch-to-lane relayout is inherently a transpose; one XLA
        # transpose copy is the cheapest way to do it for small F (padded rows give a
        # finite h = bias and are sliced off below).
        xt = x.T
        if b_pad != B:
            xt = jnp.pad(xt, ((0, 0), (0, b_pad - B)))
    x3 = xt.reshape(F, rows, _LANE)                # zero-copy split of the batch axis

    smem = pl.BlockSpec(memory_space=pltpu.MemorySpace.SMEM)
    out2 = pl.pallas_call(
        partial(_monotonic_kernel, group_offsets=offsets, chunk_rows=cr),
        out_shape=jax.ShapeDtypeStruct((rows, _LANE), jnp.float32),
        grid=(b_pad // tile_b,),
        in_specs=[
            smem,                                                      # w_eff (H*F,)
            smem,                                                      # bias  (H,)
            pl.BlockSpec((F, tile_rows, _LANE), lambda i: (0, i, 0)),  # x tile
        ],
        out_specs=pl.BlockSpec((tile_rows, _LANE), lambda i: (i, 0)),
        compiler_params=pltpu.CompilerParams(
            dimension_semantics=("parallel",),
            vmem_limit_bytes=vmem_limit),
        cost_estimate=pl.CostEstimate(
            flops=2 * b_pad * H * F,
            transcendentals=0,
            bytes_accessed=b_pad * F * itemsize + b_pad * 4 + (H * F + H) * 4),
    )(w_eff, bias1, x3)

    return out2.reshape(b_pad, 1)[:B]


def reference_forward(x, weight, bias, signs, group_sizes):
    """Pure-JAX reference mirroring the PyTorch module."""
    w_eff = jnp.exp(weight.astype(jnp.float32)) * signs.astype(jnp.float32)[None, :]
    h = x.astype(jnp.float32) @ w_eff.T + bias.astype(jnp.float32)[None, :]
    outs = []
    off = 0
    for s in group_sizes:
        outs.append(jnp.max(h[:, off:off + s], axis=1, keepdims=True))
        off += s
    g = jnp.concatenate(outs, axis=1)
    return jnp.min(g, axis=1, keepdims=True)


if __name__ == "__main__":
    # Small shapes consistent with the module.
    batch = 8
    in_features = 4
    group_sizes = [3, 2, 3]            # sum = 8 hidden units, 3 groups
    increasing = [True, False, True, False]
    hidden = sum(group_sizes)

    key = jax.random.PRNGKey(0)
    kx, kw, kb, kx2 = jax.random.split(key, 4)

    bound = 1.0 / math.sqrt(in_features)
    weight = jax.random.uniform(kw, (hidden, in_features), jnp.float32,
                                minval=-bound, maxval=bound)
    bias = jax.random.uniform(kb, (hidden,), jnp.float32,
                              minval=-bound, maxval=bound)
    signs = jnp.array([1.0 if inc else -1.0 for inc in increasing], jnp.float32)

    # 1) Small batch, batch-major.
    x = jax.random.normal(kx, (batch, in_features), jnp.float32)
    out = jax.block_until_ready(
        monotonic_net_forward(x, weight, bias, signs, group_sizes))
    ref = reference_forward(x, weight, bias, signs, group_sizes)
    assert out.shape == (batch, 1)
    assert jnp.allclose(out, ref, atol=1e-5, rtol=1e-5), (out, ref)

    # 2) Multi-tile grid path (grid > 1, batch padding / slicing, in-kernel chunk loop).
    x_big = jax.random.normal(kx2, (2500, in_features), jnp.float32)
    out_big = jax.block_until_ready(
        monotonic_net_forward(x_big, weight, bias, signs, group_sizes, max_tile_b=1024))
    ref_big = reference_forward(x_big, weight, bias, signs, group_sizes)
    assert out_big.shape == (2500, 1)
    assert jnp.allclose(out_big, ref_big, atol=1e-5, rtol=1e-5)

    # 3) Feature-major fast path (no wrapper-side transpose at all).
    out_fm = jax.block_until_ready(
        monotonic_net_forward(x_big.T, weight, bias, signs, group_sizes,
                              feature_major=True, max_tile_b=2048))
    assert out_fm.shape == (2500, 1)
    assert jnp.allclose(out_fm, ref_big, atol=1e-5, rtol=1e-5)

    # 4) bf16 on the wire (halves HBM read bytes; useful on bandwidth-poor v5e).
    out_bf = jax.block_until_ready(
        monotonic_net_forward(x_big.astype(jnp.bfloat16), weight, bias, signs,
                              group_sizes, max_tile_b=2048))
    assert out_bf.shape == (2500, 1)
    assert jnp.allclose(out_bf, ref_big, atol=5e-2, rtol=5e-2)

    print("KERNEL_OK")
</pallas_src>

<mosaic_0001>
module attributes {stable_mosaic.version = 11 : i64} {
  func.func @_monotonic_kernel(%arg0: i32, %arg1: memref<32xf32, #tpu.memory_space<smem>>, %arg2: memref<8xf32, #tpu.memory_space<smem>>, %arg3: memref<4x8x128xf32, #tpu.memory_space<vmem>>, %arg4: memref<8x128xf32, #tpu.memory_space<vmem>>) attributes {dimension_semantics = [#tpu.dimension_semantics<parallel>], iteration_bounds = array<i64: 1>, scalar_prefetch = 0 : i64, scratch_operands = 0 : i64, tpu.core_type = #tpu.core_type<tc>, window_params = [{transform_indices = @transform_0, window_bounds = array<i64: 32>}, {transform_indices = @transform_1, window_bounds = array<i64: 8>}, {transform_indices = @transform_2, window_bounds = array<i64: 4, 8, 128>}, {transform_indices = @transform_3, window_bounds = array<i64: 8, 128>}]} {
    %c0 = arith.constant 0 : index
    %0 = memref.load %arg1[%c0] : memref<32xf32, #tpu.memory_space<smem>>
    %c1 = arith.constant 1 : index
    %1 = memref.load %arg1[%c1] : memref<32xf32, #tpu.memory_space<smem>>
    %c2 = arith.constant 2 : index
    %2 = memref.load %arg1[%c2] : memref<32xf32, #tpu.memory_space<smem>>
    %c3 = arith.constant 3 : index
    %3 = memref.load %arg1[%c3] : memref<32xf32, #tpu.memory_space<smem>>
    %c4 = arith.constant 4 : index
    %4 = memref.load %arg1[%c4] : memref<32xf32, #tpu.memory_space<smem>>
    %c5 = arith.constant 5 : index
    %5 = memref.load %arg1[%c5] : memref<32xf32, #tpu.memory_space<smem>>
    %c6 = arith.constant 6 : index
    %6 = memref.load %arg1[%c6] : memref<32xf32, #tpu.memory_space<smem>>
    %c7 = arith.constant 7 : index
    %7 = memref.load %arg1[%c7] : memref<32xf32, #tpu.memory_space<smem>>
    %c8 = arith.constant 8 : index
    %8 = memref.load %arg1[%c8] : memref<32xf32, #tpu.memory_space<smem>>
    %c9 = arith.constant 9 : index
    %9 = memref.load %arg1[%c9] : memref<32xf32, #tpu.memory_space<smem>>
    %c10 = arith.constant 10 : index
    %10 = memref.load %arg1[%c10] : memref<32xf32, #tpu.memory_space<smem>>
    %c11 = arith.constant 11 : index
    %11 = memref.load %arg1[%c11] : memref<32xf32, #tpu.memory_space<smem>>
    %c12 = arith.constant 12 : index
    %12 = memref.load %arg1[%c12] : memref<32xf32, #tpu.memory_space<smem>>
    %c13 = arith.constant 13 : index
    %13 = memref.load %arg1[%c13] : memref<32xf32, #tpu.memory_space<smem>>
    %c14 = arith.constant 14 : index
    %14 = memref.load %arg1[%c14] : memref<32xf32, #tpu.memory_space<smem>>
    %c15 = arith.constant 15 : index
    %15 = memref.load %arg1[%c15] : memref<32xf32, #tpu.memory_space<smem>>
    %c16 = arith.constant 16 : index
    %16 = memref.load %arg1[%c16] : memref<32xf32, #tpu.memory_space<smem>>
    %c17 = arith.constant 17 : index
    %17 = memref.load %arg1[%c17] : memref<32xf32, #tpu.memory_space<smem>>
    %c18 = arith.constant 18 : index
    %18 = memref.load %arg1[%c18] : memref<32xf32, #tpu.memory_space<smem>>
    %c19 = arith.constant 19 : index
    %19 = memref.load %arg1[%c19] : memref<32xf32, #tpu.memory_space<smem>>
    %c20 = arith.constant 20 : index
    %20 = memref.load %arg1[%c20] : memref<32xf32, #tpu.memory_space<smem>>
    %c21 = arith.constant 21 : index
    %21 = memref.load %arg1[%c21] : memref<32xf32, #tpu.memory_space<smem>>
    %c22 = arith.constant 22 : index
    %22 = memref.load %arg1[%c22] : memref<32xf32, #tpu.memory_space<smem>>
    %c23 = arith.constant 23 : index
    %23 = memref.load %arg1[%c23] : memref<32xf32, #tpu.memory_space<smem>>
    %c24 = arith.constant 24 : index
    %24 = memref.load %arg1[%c24] : memref<32xf32, #tpu.memory_space<smem>>
    %c25 = arith.constant 25 : index
    %25 = memref.load %arg1[%c25] : memref<32xf32, #tpu.memory_space<smem>>
    %c26 = arith.constant 26 : index
    %26 = memref.load %arg1[%c26] : memref<32xf32, #tpu.memory_space<smem>>
    %c27 = arith.constant 27 : index
    %27 = memref.load %arg1[%c27] : memref<32xf32, #tpu.memory_space<smem>>
    %c28 = arith.constant 28 : index
    %28 = memref.load %arg1[%c28] : memref<32xf32, #tpu.memory_space<smem>>
    %c29 = arith.constant 29 : index
    %29 = memref.load %arg1[%c29] : memref<32xf32, #tpu.memory_space<smem>>
    %c30 = arith.constant 30 : index
    %30 = memref.load %arg1[%c30] : memref<32xf32, #tpu.memory_space<smem>>
    %c31 = arith.constant 31 : index
    %31 = memref.load %arg1[%c31] : memref<32xf32, #tpu.memory_space<smem>>
    %c0_0 = arith.constant 0 : index
    %32 = memref.load %arg2[%c0_0] : memref<8xf32, #tpu.memory_space<smem>>
    %c1_1 = arith.constant 1 : index
    %33 = memref.load %arg2[%c1_1] : memref<8xf32, #tpu.memory_space<smem>>
    %c2_2 = arith.constant 2 : index
    %34 = memref.load %arg2[%c2_2] : memref<8xf32, #tpu.memory_space<smem>>
    %c3_3 = arith.constant 3 : index
    %35 = memref.load %arg2[%c3_3] : memref<8xf32, #tpu.memory_space<smem>>
    %c4_4 = arith.constant 4 : index
    %36 = memref.load %arg2[%c4_4] : memref<8xf32, #tpu.memory_space<smem>>
    %c5_5 = arith.constant 5 : index
    %37 = memref.load %arg2[%c5_5] : memref<8xf32, #tpu.memory_space<smem>>
    %c6_6 = arith.constant 6 : index
    %38 = memref.load %arg2[%c6_6] : memref<8xf32, #tpu.memory_space<smem>>
    %c7_7 = arith.constant 7 : index
    %39 = memref.load %arg2[%c7_7] : memref<8xf32, #tpu.memory_space<smem>>
    %c0_i32 = arith.constant 0 : i32
    %c8_i32 = arith.constant 8 : i32
    %40 = arith.muli %c0_i32, %c8_i32 : i32
    %41 = tpu.assume_multiple %40, 8 : i32
    %c0_8 = arith.constant 0 : index
    %42 = arith.index_cast %41 : i32 to index
    %c0_9 = arith.constant 0 : index
    %43 = vector.load %arg3[%c0_8, %42, %c0_9] : memref<4x8x128xf32, #tpu.memory_space<vmem>>, vector<4x8x128xf32>
    %44 = vector.extract_strided_slice %43 {offsets = [0, 0, 0], sizes = [1, 8, 128], strides = [1, 1, 1]} : vector<4x8x128xf32> to vector<1x8x128xf32>
    %45 = vector.shape_cast %44 : vector<1x8x128xf32> to vector<8x128xf32>
    %46 = vector.extract_strided_slice %43 {offsets = [1, 0, 0], sizes = [1, 8, 128], strides = [1, 1, 1]} : vector<4x8x128xf32> to vector<1x8x128xf32>
    %47 = vector.shape_cast %46 : vector<1x8x128xf32> to vector<8x128xf32>
    %48 = vector.extract_strided_slice %43 {offsets = [2, 0, 0], sizes = [1, 8, 128], strides = [1, 1, 1]} : vector<4x8x128xf32> to vector<1x8x128xf32>
    %49 = vector.shape_cast %48 : vector<1x8x128xf32> to vector<8x128xf32>
    %50 = vector.extract_strided_slice %43 {offsets = [3, 0, 0], sizes = [1, 8, 128], strides = [1, 1, 1]} : vector<4x8x128xf32> to vector<1x8x128xf32>
    %51 = vector.shape_cast %50 : vector<1x8x128xf32> to vector<8x128xf32>
    %52 = vector.broadcast %0 : f32 to vector<8x128xf32>
    %53 = arith.mulf %45, %52 : vector<8x128xf32>
    %54 = vector.broadcast %32 : f32 to vector<8x128xf32>
    %55 = arith.addf %53, %54 : vector<8x128xf32>
    %56 = vector.broadcast %1 : f32 to vector<8x128xf32>
    %57 = arith.mulf %47, %56 : vector<8x128xf32>
    %58 = arith.addf %55, %57 : vector<8x128xf32>
    %59 = vector.broadcast %2 : f32 to vector<8x128xf32>
    %60 = arith.mulf %49, %59 : vector<8x128xf32>
    %61 = arith.addf %58, %60 : vector<8x128xf32>
    %62 = vector.broadcast %3 : f32 to vector<8x128xf32>
    %63 = arith.mulf %51, %62 : vector<8x128xf32>
    %64 = arith.addf %61, %63 : vector<8x128xf32>
    %65 = vector.broadcast %4 : f32 to vector<8x128xf32>
    %66 = arith.mulf %45, %65 : vector<8x128xf32>
    %67 = vector.broadcast %33 : f32 to vector<8x128xf32>
    %68 = arith.addf %66, %67 : vector<8x128xf32>
    %69 = vector.broadcast %5 : f32 to vector<8x128xf32>
    %70 = arith.mulf %47, %69 : vector<8x128xf32>
    %71 = arith.addf %68, %70 : vector<8x128xf32>
    %72 = vector.broadcast %6 : f32 to vector<8x128xf32>
    %73 = arith.mulf %49, %72 : vector<8x128xf32>
    %74 = arith.addf %71, %73 : vector<8x128xf32>
    %75 = vector.broadcast %7 : f32 to vector<8x128xf32>
    %76 = arith.mulf %51, %75 : vector<8x128xf32>
    %77 = arith.addf %74, %76 : vector<8x128xf32>
    %78 = arith.maximumf %64, %77 : vector<8x128xf32>
    %79 = vector.broadcast %8 : f32 to vector<8x128xf32>
    %80 = arith.mulf %45, %79 : vector<8x128xf32>
    %81 = vector.broadcast %34 : f32 to vector<8x128xf32>
    %82 = arith.addf %80, %81 : vector<8x128xf32>
    %83 = vector.broadcast %9 : f32 to vector<8x128xf32>
    %84 = arith.mulf %47, %83 : vector<8x128xf32>
    %85 = arith.addf %82, %84 : vector<8x128xf32>
    %86 = vector.broadcast %10 : f32 to vector<8x128xf32>
    %87 = arith.mulf %49, %86 : vector<8x128xf32>
    %88 = arith.addf %85, %87 : vector<8x128xf32>
    %89 = vector.broadcast %11 : f32 to vector<8x128xf32>
    %90 = arith.mulf %51, %89 : vector<8x128xf32>
    %91 = arith.addf %88, %90 : vector<8x128xf32>
    %92 = arith.maximumf %78, %91 : vector<8x128xf32>
    %93 = vector.broadcast %12 : f32 to vector<8x128xf32>
    %94 = arith.mulf %45, %93 : vector<8x128xf32>
    %95 = vector.broadcast %35 : f32 to vector<8x128xf32>
    %96 = arith.addf %94, %95 : vector<8x128xf32>
    %97 = vector.broadcast %13 : f32 to vector<8x128xf32>
    %98 = arith.mulf %47, %97 : vector<8x128xf32>
    %99 = arith.addf %96, %98 : vector<8x128xf32>
    %100 = vector.broadcast %14 : f32 to vector<8x128xf32>
    %101 = arith.mulf %49, %100 : vector<8x128xf32>
    %102 = arith.addf %99, %101 : vector<8x128xf32>
    %103 = vector.broadcast %15 : f32 to vector<8x128xf32>
    %104 = arith.mulf %51, %103 : vector<8x128xf32>
    %105 = arith.addf %102, %104 : vector<8x128xf32>
    %106 = vector.broadcast %16 : f32 to vector<8x128xf32>
    %107 = arith.mulf %45, %106 : vector<8x128xf32>
    %108 = vector.broadcast %36 : f32 to vector<8x128xf32>
    %109 = arith.addf %107, %108 : vector<8x128xf32>
    %110 = vector.broadcast %17 : f32 to vector<8x128xf32>
    %111 = arith.mulf %47, %110 : vector<8x128xf32>
    %112 = arith.addf %109, %111 : vector<8x128xf32>
    %113 = vector.broadcast %18 : f32 to vector<8x128xf32>
    %114 = arith.mulf %49, %113 : vector<8x128xf32>
    %115 = arith.addf %112, %114 : vector<8x128xf32>
    %116 = vector.broadcast %19 : f32 to vector<8x128xf32>
    %117 = arith.mulf %51, %116 : vector<8x128xf32>
    %118 = arith.addf %115, %117 : vector<8x128xf32>
    %119 = arith.maximumf %105, %118 : vector<8x128xf32>
    %120 = arith.minimumf %92, %119 : vector<8x128xf32>
    %121 = vector.broadcast %20 : f32 to vector<8x128xf32>
    %122 = arith.mulf %45, %121 : vector<8x128xf32>
    %123 = vector.broadcast %37 : f32 to vector<8x128xf32>
    %124 = arith.addf %122, %123 : vector<8x128xf32>
    %125 = vector.broadcast %21 : f32 to vector<8x128xf32>
    %126 = arith.mulf %47, %125 : vector<8x128xf32>
    %127 = arith.addf %124, %126 : vector<8x128xf32>
    %128 = vector.broadcast %22 : f32 to vector<8x128xf32>
    %129 = arith.mulf %49, %128 : vector<8x128xf32>
    %130 = arith.addf %127, %129 : vector<8x128xf32>
    %131 = vector.broadcast %23 : f32 to vector<8x128xf32>
    %132 = arith.mulf %51, %131 : vector<8x128xf32>
    %133 = arith.addf %130, %132 : vector<8x128xf32>
    %134 = vector.broadcast %24 : f32 to vector<8x128xf32>
    %135 = arith.mulf %45, %134 : vector<8x128xf32>
    %136 = vector.broadcast %38 : f32 to vector<8x128xf32>
    %137 = arith.addf %135, %136 : vector<8x128xf32>
    %138 = vector.broadcast %25 : f32 to vector<8x128xf32>
    %139 = arith.mulf %47, %138 : vector<8x128xf32>
    %140 = arith.addf %137, %139 : vector<8x128xf32>
    %141 = vector.broadcast %26 : f32 to vector<8x128xf32>
    %142 = arith.mulf %49, %141 : vector<8x128xf32>
    %143 = arith.addf %140, %142 : vector<8x128xf32>
    %144 = vector.broadcast %27 : f32 to vector<8x128xf32>
    %145 = arith.mulf %51, %144 : vector<8x128xf32>
    %146 = arith.addf %143, %145 : vector<8x128xf32>
    %147 = arith.maximumf %133, %146 : vector<8x128xf32>
    %148 = vector.broadcast %28 : f32 to vector<8x128xf32>
    %149 = arith.mulf %45, %148 : vector<8x128xf32>
    %150 = vector.broadcast %39 : f32 to vector<8x128xf32>
    %151 = arith.addf %149, %150 : vector<8x128xf32>
    %152 = vector.broadcast %29 : f32 to vector<8x128xf32>
    %153 = arith.mulf %47, %152 : vector<8x128xf32>
    %154 = arith.addf %151, %153 : vector<8x128xf32>
    %155 = vector.broadcast %30 : f32 to vector<8x128xf32>
    %156 = arith.mulf %49, %155 : vector<8x128xf32>
    %157 = arith.addf %154, %156 : vector<8x128xf32>
    %158 = vector.broadcast %31 : f32 to vector<8x128xf32>
    %159 = arith.mulf %51, %158 : vector<8x128xf32>
    %160 = arith.addf %157, %159 : vector<8x128xf32>
    %161 = arith.maximumf %147, %160 : vector<8x128xf32>
    %162 = arith.minimumf %120, %161 : vector<8x128xf32>
    %163 = arith.index_cast %41 : i32 to index
    %c0_10 = arith.constant 0 : index
    %164 = vector.load %arg4[%163, %c0_10] : memref<8x128xf32, #tpu.memory_space<vmem>>, vector<8x128xf32>
    tpu.vector_store %arg4[%163, %c0_10], %162 {strides = array<i32>} : memref<8x128xf32, #tpu.memory_space<vmem>>, vector<8x128xf32>,
    %c1_i32 = arith.constant 1 : i32
    return
  }
  func.func @transform_0(%arg0: i32) -> i32 {
    %c0_i32 = arith.constant 0 : i32
    %c0_i32_0 = arith.constant 0 : i32
    return %c0_i32 : i32
  }
  func.func @transform_1(%arg0: i32) -> i32 {
    %c0_i32 = arith.constant 0 : i32
    %c0_i32_0 = arith.constant 0 : i32
    return %c0_i32 : i32
  }
  func.func @transform_2(%arg0: i32) -> (i32, i32, i32) {
    %c0_i32 = arith.constant 0 : i32
    %c0_i32_0 = arith.constant 0 : i32
    %c0_i32_1 = arith.constant 0 : i32
    return %c0_i32, %arg0, %c0_i32_0 : i32, i32, i32
  }
  func.func @transform_3(%arg0: i32) -> (i32, i32) {
    %c0_i32 = arith.constant 0 : i32
    %c0_i32_0 = arith.constant 0 : i32
    return %arg0, %c0_i32 : i32, i32
  }
}

</mosaic_0001>

<bundles_post_ra>
// kernel: tpu_custom_call.1
= control target key start
LH: loop header
LB: loop body
LE: loop exit
PB: predicated region body
PF: predicated region fallthrough
CT: control target
= control target key end

     0   :  { %8 = vsyncpa [#allocation5], 0  ;;  %s598_s0 = inlined_call_operand.hbm [shape: f32[32], index: 0, kind: input, shape index: {}]   ;;  %s599_s1 = inlined_call_operand.vmem [shape: f32[8], index: 1, kind: input, shape index: {}]   ;;  %s600_s2 = inlined_call_operand.hbm [shape: f32[4,8,128], index: 2, kind: input, shape index: {}]   ;;  %s601_s3 = inlined_call_operand.hbm [shape: f32[8,128], index: 3, kind: output, shape index: {}]  }
   0x1   :  { %9 = vsyncpa [#allocation6], 0 }
   0x2   :  { %10 = vsyncpa [#allocation3], 0 }
   0x3   :  { %11 = vsyncpa [#allocation4], 0  ;;  %s26_s14 = sshll.u32 %s599_s1, 4  ;;  %s269_s17 = scalar_lea.hbm %s598_s0, 16  ;;  %s27_s14 = int_to_ptr.vmem [resolvable:$true] %s26_s14 }
   0x4   :  { %p270_p0 = scmp.ne.s32.totalorder %s598_s0, %s269_s17  ;;  %p273_p1 = scmp.lt.u32.totalorder %s269_s17, %s598_s0 }
   0x6   :  { %p275_p2 = pnand %p273_p1, %p270_p0 }
   0x8   :  { %278 = shalt.err (!%p275_p2)
}
   0x9   :  { %s343_s22 = smov [#allocation2]   ;;  %s279_s1 = scalar_lea.vmem %s27_s14, 16 }
   0xa   :  { %19 = dma.hbm_to_smem %s598_s0, 16, %s343_s22, [#allocation5]  }
   0xb   :  { %p280_p3 = scmp.ne.s32.totalorder %s27_s14, %s279_s1  ;;  %p284_p4 = scmp.lt.s32.totalorder %s27_s14, %s27_s14 }
   0xc   :  { %p285_p5 = scmp.lt.s32.totalorder %s279_s1, %s279_s1 }
   0xe   :  { %p286_p6 = por %p285_p5, %p284_p4 }
  0x10   :  { %p287_p7 = pnand %p286_p6, %p280_p3 }
  0x12   :  { %290 = shalt.err (!%p287_p7)
}
  0x13   :  { %s344_s25 = smov [#allocation7]   ;;  %s345_s26 = smov [#allocation8]  }
  0x14   :  { %29 = dma.vmem_to_smem %s27_s14, 16, %s344_s25, [#allocation6]  }
  0x15   :  { %s35_s27 = sshll.u32 %s345_s26, 4  ;;  %s291_s30 = scalar_lea.hbm %s600_s2, 512  ;;  %s36_s27 = int_to_ptr.vmem [resolvable:$true] %s35_s27 }
  0x16   :  { %p292_p8 = scmp.ne.s32.totalorder %s600_s2, %s291_s30  ;;  %p295_p9 = scmp.lt.u32.totalorder %s291_s30, %s600_s2 }
  0x18   :  { %p297_p10 = pnand %p295_p9, %p292_p8 }
  0x1a   :  { %300 = shalt.err (!%p297_p10)
}
  0x1b   :  { %s301_s7 = scalar_lea.vmem %s36_s27, 512  ;;  %p306_p12 = scmp.lt.s32.totalorder %s36_s27, %s36_s27 }
  0x1c   :  { %p302_p11 = scmp.ne.s32.totalorder %s36_s27, %s301_s7  ;;  %p307_p13 = scmp.lt.s32.totalorder %s301_s7, %s301_s7 }
  0x1e   :  { %p308_p0 = por %p307_p13, %p306_p12 }
  0x20   :  { %p309_p1 = pnand %p308_p0, %p302_p11 }
  0x22   :  { %312 = shalt.err (!%p309_p1)
}
  0x23   :  { %s346_s8 = smov 128   ;;  %s347_s9 = smov 8  }
  0x24   :  { %41 = dma.hbm_to_vmem [thread:$0]  %s600_s2, 512, %s36_s27, [#allocation3], %s346_s8, %s346_s8, %s347_s9  }
  0x25   :  { %335 = dma.done.wait [#allocation5], 16  }
  0x26   :  { %336 = vsyncadd [#allocation5], 4294967280 }
  0x27   :  { %337 = dma.done.wait [#allocation6], 16  }
  0x28   :  { %338 = vsyncadd [#allocation6], 4294967280 }
  0x29   :  { %339 = dma.done.wait [#allocation3], 512  }
  0x2a   :  { %340 = vsyncadd [#allocation3], 4294966784 }
  0x2b   :  { %51 = sfence }
  0x2c   :  { %s52_s12 = sld [smem:[#allocation2]]  ;;  %s225_s13 = sld [smem:[#allocation2 + $0x1]]  ;;  %v404_v0 = vld [vmem:[#allocation8] sm:$0xff]  ;;  %v406_v1 = vld [vmem:[#allocation8 + $0x8] sm:$0xff]  ;;  %v412_v2 = vld [vmem:[#allocation8 + $0x10] sm:$0xff] }
  0x2d   :  { %s226_s14 = sld [smem:[#allocation2 + $0x2]]  ;;  %s227_s15 = sld [smem:[#allocation2 + $0x3]]  ;;  %v414_v3 = vld [vmem:[#allocation8 + $0x18] sm:$0xff] }
  0x2e   :  { %s228_s16 = sld [smem:[#allocation2 + $0x4]]  ;;  %s229_s17 = sld [smem:[#allocation2 + $0x5]] }
  0x2f   :  { %s396_s18 = sld [smem:[#allocation2 + $0x6]]  ;;  %s398_s19 = sld [smem:[#allocation2 + $0x7]] }
  0x30   :  { %s400_s20 = sld [smem:[#allocation2 + $0x8]]  ;;  %s402_s2 = sld [smem:[#allocation2 + $0x9]] }
  0x31   :  { %s408_s21 = sld [smem:[#allocation2 + $0xa]]  ;;  %s410_s22 = sld [smem:[#allocation2 + $0xb]] }
  0x32   :  { %s416_s23 = sld [smem:[#allocation2 + $0xc]]  ;;  %s418_s24 = sld [smem:[#allocation2 + $0xd]]  ;;  %v96_v4 = vstv %s52_s12  ;;  %v100_v5 = vstv %s225_s13 }
  0x33   :  { %s420_s1 = sld [smem:[#allocation2 + $0xe]]  ;;  %s422_s25 = sld [smem:[#allocation2 + $0xf]]  ;;  %v425_v6 = vmul.f32 %v96_v4, %v404_v0  ;;  %v428_v7 = vmul.f32 %v100_v5, %v406_v1  ;;  %v103_v8 = vstv %s226_s14  ;;  %v106_v9 = vstv %s227_s15 }
  0x34   :  { %s430_s26 = sld [smem:[#allocation2 + $0x10]]  ;;  %s432_s27 = sld [smem:[#allocation2 + $0x11]]  ;;  %v435_v10 = vmul.f32 %v103_v8, %v412_v2  ;;  %v438_v11 = vmul.f32 %v106_v9, %v414_v3  ;;  %v109_v12 = vstv %s228_s16  ;;  %v113_v13 = vstv %s229_s17 }
  0x35   :  { %s440_s28 = sld [smem:[#allocation2 + $0x12]]  ;;  %s442_s29 = sld [smem:[#allocation2 + $0x13]]  ;;  %v445_v14 = vmul.f32 %v109_v12, %v404_v0  ;;  %v448_v15 = vmul.f32 %v113_v13, %v406_v1  ;;  %v116_v16 = vstv %s396_s18  ;;  %v119_v17 = vstv %s398_s19 }
  0x36   :  { %s452_s30 = sld [smem:[#allocation2 + $0x14]]  ;;  %s454_s4 = sld [smem:[#allocation2 + $0x15]]  ;;  %v457_v18 = vmul.f32 %v116_v16, %v412_v2  ;;  %v460_v19 = vmul.f32 %v119_v17, %v414_v3  ;;  %v123_v20 = vstv %s400_s20  ;;  %v127_v21 = vstv %s402_s2 }
  0x37   :  { %s464_s5 = sld [smem:[#allocation2 + $0x16]]  ;;  %s466_s0 = sld [smem:[#allocation2 + $0x17]]  ;;  %v469_v22 = vmul.f32 %v123_v20, %v404_v0  ;;  %v472_v23 = vmul.f32 %v127_v21, %v406_v1  ;;  %v130_v24 = vstv %s408_s21  ;;  %v133_v25 = vstv %s410_s22 }
  0x38   :  { %s476_s6 = sld [smem:[#allocation2 + $0x18]]  ;;  %s478_s7 = sld [smem:[#allocation2 + $0x19]]  ;;  %v481_v26 = vmul.f32 %v130_v24, %v412_v2  ;;  %v484_v27 = vmul.f32 %v133_v25, %v414_v3  ;;  %v137_v28 = vstv %s416_s23  ;;  %v141_v29 = vstv %s418_s24 }
  0x39   :  { %s488_s8 = sld [smem:[#allocation2 + $0x1a]]  ;;  %s490_s9 = sld [smem:[#allocation2 + $0x1b]]  ;;  %v138_v30 = vmul.f32 %v137_v28, %v404_v0  ;;  %v494_v31 = vmul.f32 %v141_v29, %v406_v1  ;;  %v144_v32 = vstv %s420_s1  ;;  %v147_v33 = vstv %s422_s25 }
  0x3a   :  { %s498_s10 = sld [smem:[#allocation2 + $0x1c]]  ;;  %s500_s11 = sld [smem:[#allocation2 + $0x1d]]  ;;  %v503_v34 = vmul.f32 %v144_v32, %v412_v2  ;;  %v506_v35 = vmul.f32 %v147_v33, %v414_v3  ;;  %v150_v36 = vstv %s430_s26  ;;  %v154_v37 = vstv %s432_s27 }
  0x3b   :  { %s510_s12 = sld [smem:[#allocation2 + $0x1e]]  ;;  %s512_s13 = sld [smem:[#allocation2 + $0x1f]]  ;;  %v151_v38 = vmul.f32 %v150_v36, %v404_v0  ;;  %v155_v39 = vmul.f32 %v154_v37, %v406_v1  ;;  %v157_v40 = vstv %s440_s28  ;;  %v160_v41 = vstv %s442_s29 }
  0x3c   :  { %s518_s14 = sld [smem:[#allocation7]]  ;;  %s520_s15 = sld [smem:[#allocation7 + $0x1]]  ;;  %v158_v42 = vmul.f32 %v157_v40, %v412_v2  ;;  %v524_v43 = vmul.f32 %v160_v41, %v414_v3  ;;  %v165_v44 = vstv %s452_s30  ;;  %v169_v45 = vstv %s454_s4 }
  0x3d   :  { %s528_s16 = sld [smem:[#allocation7 + $0x2]]  ;;  %s530_s17 = sld [smem:[#allocation7 + $0x3]]  ;;  %v166_v46 = vmul.f32 %v165_v44, %v404_v0  ;;  %v170_v47 = vmul.f32 %v169_v45, %v406_v1  ;;  %v172_v48 = vstv %s464_s5  ;;  %v175_v49 = vstv %s466_s0 }
  0x3e   :  { %s536_s18 = sld [smem:[#allocation7 + $0x4]]  ;;  %s538_s19 = sld [smem:[#allocation7 + $0x5]]  ;;  %v173_v50 = vmul.f32 %v172_v48, %v412_v2  ;;  %v176_v51 = vmul.f32 %v175_v49, %v414_v3  ;;  %v178_v52 = vstv %s476_s6  ;;  %v182_v53 = vstv %s478_s7 }
  0x3f   :  { %s544_s20 = sld [smem:[#allocation7 + $0x6]]  ;;  %s546_s2 = sld [smem:[#allocation7 + $0x7]]  ;;  %v179_v54 = vmul.f32 %v178_v52, %v404_v0  ;;  %v183_v55 = vmul.f32 %v182_v53, %v406_v1  ;;  %v185_v56 = vstv %s488_s8  ;;  %v188_v57 = vstv %s490_s9 }
  0x40   :  { %v186_v58 = vmul.f32 %v185_v56, %v412_v2  ;;  %v189_v59 = vmul.f32 %v188_v57, %v414_v3  ;;  %v192_v60 = vstv %s498_s10  ;;  %v196_v61 = vstv %s500_s11  ;;  %s348_s21 = smov [#allocation9]  }
  0x41   :  { %v193_v62 = vmul.f32 %v192_v60, %v404_v0  ;;  %v197_v63 = vmul.f32 %v196_v61, %v406_v1  ;;  %v199_v4 = vstv %s510_s12  ;;  %v202_v5 = vstv %s512_s13  ;;  %s214_s22 = sshll.u32 %s348_s21, 4  ;;  %s215_s22 = int_to_ptr.vmem [resolvable:$true] %s214_s22 }
  0x42   :  { %v98_v8 = vstv %s518_s14  ;;  %v111_v9 = vstv %s520_s15  ;;  %v200_v12 = vmul.f32 %v199_v4, %v412_v2  ;;  %v203_v13 = vmul.f32 %v202_v5, %v414_v3  ;;  %s313_s23 = scalar_lea.vmem %s215_s22, 128  ;;  %p318_p3 = scmp.lt.s32.totalorder %s215_s22, %s215_s22 }
  0x43   :  { %v99_v16 = vadd.f32 %v98_v8, %v425_v6  ;;  %v112_v17 = vadd.f32 %v111_v9, %v445_v14  ;;  %v125_v20 = vstv %s528_s16  ;;  %v139_v21 = vstv %s530_s17  ;;  %p314_p2 = scmp.ne.s32.totalorder %s215_s22, %s313_s23  ;;  %p319_p4 = scmp.lt.s32.totalorder %s313_s23, %s313_s23 }
  0x44   :  { %v126_v0 = vadd.f32 %v125_v20, %v469_v22  ;;  %v140_v24 = vadd.f32 %v139_v21, %v138_v30  ;;  %v152_v1 = vstv %s536_s18  ;;  %v167_v25 = vstv %s538_s19 }
  0x45   :  { %v102_v28 = vadd.f32 %v428_v7, %v99_v16  ;;  %v115_v29 = vadd.f32 %v448_v15, %v112_v17  ;;  %v153_v2 = vadd.f32 %v152_v1, %v151_v38  ;;  %v168_v32 = vadd.f32 %v167_v25, %v166_v46  ;;  %p320_p5 = por %p319_p4, %p318_p3 }
  0x46   :  { %v129_v3 = vadd.f32 %v472_v23, %v126_v0  ;;  %v143_v33 = vadd.f32 %v494_v31, %v140_v24  ;;  %v180_v6 = vstv %s544_s20  ;;  %v194_v36 = vstv %s546_s2 }
  0x47   :  { %v105_v14 = vadd.f32 %v435_v10, %v102_v28  ;;  %v118_v37 = vadd.f32 %v457_v18, %v115_v29  ;;  %v156_v22 = vadd.f32 %v155_v39, %v153_v2  ;;  %v171_v30 = vadd.f32 %v170_v47, %v168_v32  ;;  %p321_p6 = pnand %p320_p5, %p314_p2 }
  0x48   :  { %v132_v40 = vadd.f32 %v481_v26, %v129_v3  ;;  %v146_v7 = vadd.f32 %v503_v34, %v143_v33  ;;  %v181_v41 = vadd.f32 %v180_v6, %v179_v54  ;;  %v195_v15 = vadd.f32 %v194_v36, %v193_v62 }
  0x49   :  { %v108_v38 = vadd.f32 %v438_v11, %v105_v14  ;;  %v121_v23 = vadd.f32 %v460_v19, %v118_v37  ;;  %v159_v44 = vadd.f32 %v158_v42, %v156_v22  ;;  %v174_v31 = vadd.f32 %v173_v50, %v171_v30 }
  0x4a   :  { %v135_v45 = vadd.f32 %v484_v27, %v132_v40  ;;  %v149_v10 = vadd.f32 %v506_v35, %v146_v7  ;;  %v184_v46 = vadd.f32 %v183_v55, %v181_v41  ;;  %v198_v18 = vadd.f32 %v197_v63, %v195_v15 }
  0x4b   :  { %v122_v39 = vmax.f32 %v108_v38, %v121_v23  ;;  %v162_v47 = vadd.f32 %v524_v43, %v159_v44  ;;  %v177_v26 = vadd.f32 %v176_v51, %v174_v31 }
  0x4c   :  { %v187_v48 = vadd.f32 %v186_v58, %v184_v46  ;;  %v201_v34 = vadd.f32 %v200_v12, %v198_v18 }
  0x4d   :  { %v136_v49 = vmax.f32 %v122_v39, %v135_v45  ;;  %v163_v52 = vmax.f32 %v149_v10, %v162_v47 }
  0x4e   :  { %v190_v53 = vadd.f32 %v189_v59, %v187_v48  ;;  %v204_v11 = vadd.f32 %v203_v13, %v201_v34 }
  0x4f   :  { %v164_v54 = vmin.f32 %v136_v49, %v163_v52 }
  0x50   :  { %v191_v19 = vmax.f32 %v177_v26, %v190_v53 }
  0x52   :  { %v205_v42 = vmax.f32 %v191_v19, %v204_v11 }
  0x54   :  { %v206_v27 = vmin.f32 %v164_v54, %v205_v42 }
  0x56   :  { %207 = vst [vmem:[#allocation9] sm:$0xff] %v206_v27 }
  0x57   :  { %324 = shalt.err (!%p321_p6)
}
  0x58   :  { %s325_s25 = scalar_lea.hbm %s601_s3, 128 }
  0x59   :  { %p326_p7 = scmp.ne.s32.totalorder %s601_s3, %s325_s25  ;;  %p329_p8 = scmp.lt.u32.totalorder %s325_s25, %s601_s3 }
  0x5b   :  { %p331_p9 = pnand %p329_p8, %p326_p7 }
  0x5d   :  { %334 = shalt.err (!%p331_p9)
}
  0x5e   :  { %217 = dma.vmem_to_hbm [thread:$0]  %s215_s22, 128, %s601_s3, [#allocation4]  }
  0x5f   :  { %341 = dma.done.wait [#allocation4], 128  }
  0x60   :  { %342 = vsyncadd [#allocation4], 4294967168 }
  0x61   :  { %221 = vsyncpa [#allocation3], 1 }
  0x62   :  { %222 = vsyncpa [#allocation4], 1 }
  0x63   :  { %223 = vsyncpa [#allocation5], 1 }
  0x64   :  { %224 = vsyncpa [#allocation6], 1 }

</bundles_post_ra>
